<compile_context>
chip_gen: v5e
topology: v5e:2x2
jax: 0.10.0
libtpu: 0.0.40
codegen_flags: <defaults>
</compile_context>

<pallas_src>
import jax
import jax.numpy as jnp
from jax.experimental import pallas as pl
from jax.experimental.pallas import tpu as pltpu

NEG_SLOPE = 0.01  # F.leaky_relu default negative_slope


def _leaky_relu(x):
    return jnp.where(x > 0, x, NEG_SLOPE * x)


def mlp_kernel(x_ref, w1_ref, b1_ref, w2_ref, b2_ref,
               w3_ref, b3_ref, w4_ref, b4_ref, o_ref):
    # x_ref: (n_input, TB) bf16  -- batch on the lane axis.
    # w*_ref: (out, in) bf16 (nn.Linear layout), b*_ref: (out, 1) f32.
    h = x_ref[...]

    h = jnp.dot(w1_ref[...], h, preferred_element_type=jnp.float32) + b1_ref[...]
    h = _leaky_relu(h).astype(jnp.bfloat16)

    h = jnp.dot(w2_ref[...], h, preferred_element_type=jnp.float32) + b2_ref[...]
    h = _leaky_relu(h).astype(jnp.bfloat16)

    h = jnp.dot(w3_ref[...], h, preferred_element_type=jnp.float32) + b3_ref[...]
    h = _leaky_relu(h).astype(jnp.bfloat16)

    h = jnp.dot(w4_ref[...], h, preferred_element_type=jnp.float32) + b4_ref[...]

    o_ref[...] = h.astype(o_ref.dtype)          # (1, TB) lane-dense store


def net_forward(x, params, *, batch_block=512):
    """x: (B, n_input) f32; params: nn.Linear-layout weights (out,in) + biases (out,1)."""
    B, n_input = x.shape
    lane = 128
    # Batch tile: multiple of 128, no larger than needed for tiny B.
    tb = min(batch_block, pl.cdiv(B, lane) * lane)
    assert tb % lane == 0
    b_pad = pl.cdiv(B, tb) * tb

    # Transpose so batch is the lane axis; cast streamed operand to bf16; pad remainder.
    x_t = x.T.astype(jnp.bfloat16)              # (n_input, B)
    if b_pad != B:
        x_t = jnp.pad(x_t, ((0, 0), (0, b_pad - B)))

    w1 = params["w1"].astype(jnp.bfloat16)
    w2 = params["w2"].astype(jnp.bfloat16)
    w3 = params["w3"].astype(jnp.bfloat16)
    w4 = params["w4"].astype(jnp.bfloat16)
    b1, b2, b3, b4 = params["b1"], params["b2"], params["b3"], params["b4"]

    def pinned(a):
        # Full-array block, same block every grid step -> loaded once, VMEM-resident.
        return pl.BlockSpec(a.shape, lambda i: (0, 0))

    out = pl.pallas_call(
        mlp_kernel,
        out_shape=jax.ShapeDtypeStruct((1, b_pad), jnp.float32),
        grid=(b_pad // tb,),
        in_specs=[
            pl.BlockSpec((n_input, tb), lambda i: (0, i)),   # x tile, pipelined
            pinned(w1), pinned(b1),
            pinned(w2), pinned(b2),
            pinned(w3), pinned(b3),
            pinned(w4), pinned(b4),
        ],
        out_specs=pl.BlockSpec((1, tb), lambda i: (0, i)),
        compiler_params=pltpu.CompilerParams(
            dimension_semantics=("parallel",)),               # megacore-shardable
    )(x_t, w1, b1, w2, b2, w3, b3, w4, b4)

    # Restore the external (B, 1) layout (cheap layout plumbing in XLA).
    return out[:, :B].T


def init_params(key, n_input):
    # Deterministic synthetic init; shapes match nn.Linear layers of Net
    # (weight is (out_features, in_features), bias kept 2-D as (out, 1)).
    ks = jax.random.split(key, 8)

    def lin(kw, kb, fan_in, fan_out):
        bound = 1.0 / jnp.sqrt(fan_in)
        w = jax.random.uniform(kw, (fan_out, fan_in), jnp.float32, -bound, bound)
        b = jax.random.uniform(kb, (fan_out, 1), jnp.float32, -bound, bound)
        return w, b

    w1, b1 = lin(ks[0], ks[1], n_input, 4)
    w2, b2 = lin(ks[2], ks[3], 4, 8)
    w3, b3 = lin(ks[4], ks[5], 8, 4)
    w4, b4 = lin(ks[6], ks[7], 4, 1)
    return {"w1": w1, "b1": b1, "w2": w2, "b2": b2,
            "w3": w3, "b3": b3, "w4": w4, "b4": b4}


def _q(v):
    # bf16 round-trip (mirrors the kernel's bf16 matmul operands).
    return v.astype(jnp.bfloat16).astype(jnp.float32)


def net_forward_ref(x, p):
    """Precision-matched reference: bf16 operands, f32 accumulate/activation."""
    h = _q(x)
    h = _leaky_relu(h @ _q(p["w1"]).T + p["b1"].T)
    h = _leaky_relu(_q(h) @ _q(p["w2"]).T + p["b2"].T)
    h = _leaky_relu(_q(h) @ _q(p["w3"]).T + p["b3"].T)
    return _q(h) @ _q(p["w4"]).T + p["b4"].T


def net_forward_ref_f32(x, p):
    """Pure-f32 reference matching the original PyTorch module semantics."""
    h = _leaky_relu(x @ p["w1"].T + p["b1"].T)
    h = _leaky_relu(h @ p["w2"].T + p["b2"].T)
    h = _leaky_relu(h @ p["w3"].T + p["b3"].T)
    return h @ p["w4"].T + p["b4"].T


if __name__ == "__main__":
    key = jax.random.PRNGKey(0)
    k_x, k_x2, k_p = jax.random.split(key, 3)

    n_input = 32
    params = init_params(k_p, n_input)

    # Main case: enough batch to exercise the grid (4 tiles of 512 on the lane axis).
    B = 2048
    x = jax.random.normal(k_x, (B, n_input), jnp.float32)
    out = jax.block_until_ready(net_forward(x, params))
    assert out.shape == (B, 1), out.shape
    assert jnp.allclose(out, net_forward_ref(x, params), atol=1e-3, rtol=1e-3)
    assert jnp.allclose(out, net_forward_ref_f32(x, params), atol=5e-2, rtol=5e-2)

    # Ragged batch: exercises the padding / remainder path (200 -> one 256-wide tile).
    B2 = 200
    x2 = jax.random.normal(k_x2, (B2, n_input), jnp.float32)
    out2 = jax.block_until_ready(net_forward(x2, params))
    assert out2.shape == (B2, 1), out2.shape
    assert jnp.allclose(out2, net_forward_ref(x2, params), atol=1e-3, rtol=1e-3)

    print("KERNEL_OK")
</pallas_src>

<mosaic_0001>
module attributes {stable_mosaic.version = 11 : i64} {
  func.func @mlp_kernel(%arg0: i32, %arg1: memref<32x512xbf16, #tpu.memory_space<vmem>>, %arg2: memref<4x32xbf16, #tpu.memory_space<vmem>>, %arg3: memref<4x1xf32, #tpu.memory_space<vmem>>, %arg4: memref<8x4xbf16, #tpu.memory_space<vmem>>, %arg5: memref<8x1xf32, #tpu.memory_space<vmem>>, %arg6: memref<4x8xbf16, #tpu.memory_space<vmem>>, %arg7: memref<4x1xf32, #tpu.memory_space<vmem>>, %arg8: memref<1x4xbf16, #tpu.memory_space<vmem>>, %arg9: memref<1x1xf32, #tpu.memory_space<vmem>>, %arg10: memref<1x512xf32, #tpu.memory_space<vmem>>) attributes {dimension_semantics = [#tpu.dimension_semantics<parallel>], iteration_bounds = array<i64: 4>, scalar_prefetch = 0 : i64, scratch_operands = 0 : i64, tpu.core_type = #tpu.core_type<tc>, window_params = [{transform_indices = @transform_0, window_bounds = array<i64: 32, 512>}, {pipeline_mode = #tpu.pipeline_mode<synchronous>, transform_indices = @transform_1, window_bounds = array<i64: 4, 32>}, {pipeline_mode = #tpu.pipeline_mode<synchronous>, transform_indices = @transform_2, window_bounds = array<i64: 4, 1>}, {pipeline_mode = #tpu.pipeline_mode<synchronous>, transform_indices = @transform_3, window_bounds = array<i64: 8, 4>}, {pipeline_mode = #tpu.pipeline_mode<synchronous>, transform_indices = @transform_4, window_bounds = array<i64: 8, 1>}, {pipeline_mode = #tpu.pipeline_mode<synchronous>, transform_indices = @transform_5, window_bounds = array<i64: 4, 8>}, {pipeline_mode = #tpu.pipeline_mode<synchronous>, transform_indices = @transform_6, window_bounds = array<i64: 4, 1>}, {pipeline_mode = #tpu.pipeline_mode<synchronous>, transform_indices = @transform_7, window_bounds = array<i64: 1, 4>}, {pipeline_mode = #tpu.pipeline_mode<synchronous>, transform_indices = @transform_8, window_bounds = array<i64: 1, 1>}, {transform_indices = @transform_9, window_bounds = array<i64: 1, 512>}]} {
    %c0 = arith.constant 0 : index
    %c0_0 = arith.constant 0 : index
    %0 = vector.load %arg1[%c0, %c0_0] : memref<32x512xbf16, #tpu.memory_space<vmem>>, vector<32x512xbf16>
    %c0_1 = arith.constant 0 : index
    %c0_2 = arith.constant 0 : index
    %1 = vector.load %arg2[%c0_1, %c0_2] : memref<4x32xbf16, #tpu.memory_space<vmem>>, vector<4x32xbf16>
    %cst = arith.constant dense<0.000000e+00> : vector<4x512xf32>
    %2 = tpu.matmul %1, %0, %cst {dimension_numbers = #tpu.dot_dimension_numbers<[1], [0], [0], [1], [0, 0, 1, 1], [], []>} : vector<4x32xbf16>, vector<32x512xbf16>, vector<4x512xf32> -> vector<4x512xf32>
    %c0_3 = arith.constant 0 : index
    %c0_4 = arith.constant 0 : index
    %3 = vector.load %arg3[%c0_3, %c0_4] : memref<4x1xf32, #tpu.memory_space<vmem>>, vector<4x1xf32>
    %4 = vector.broadcast %3 : vector<4x1xf32> to vector<4x512xf32>
    %5 = arith.addf %2, %4 : vector<4x512xf32>
    %cst_5 = arith.constant 0.000000e+00 : f32
    %6 = vector.broadcast %cst_5 : f32 to vector<4x512xf32>
    %7 = arith.cmpf ogt, %5, %6 : vector<4x512xf32>
    %cst_6 = arith.constant 0.00999999977 : f32
    %8 = vector.broadcast %cst_6 : f32 to vector<4x512xf32>
    %9 = arith.mulf %8, %5 : vector<4x512xf32>
    %10 = arith.select %7, %5, %9 : vector<4x512xi1>, vector<4x512xf32>
    %11 = arith.truncf %10 : vector<4x512xf32> to vector<4x512xbf16>
    %c0_7 = arith.constant 0 : index
    %c0_8 = arith.constant 0 : index
    %12 = vector.load %arg4[%c0_7, %c0_8] : memref<8x4xbf16, #tpu.memory_space<vmem>>, vector<8x4xbf16>
    %cst_9 = arith.constant dense<0.000000e+00> : vector<8x512xf32>
    %13 = tpu.matmul %12, %11, %cst_9 {dimension_numbers = #tpu.dot_dimension_numbers<[1], [0], [0], [1], [0, 0, 1, 1], [], []>} : vector<8x4xbf16>, vector<4x512xbf16>, vector<8x512xf32> -> vector<8x512xf32>
    %c0_10 = arith.constant 0 : index
    %c0_11 = arith.constant 0 : index
    %14 = vector.load %arg5[%c0_10, %c0_11] : memref<8x1xf32, #tpu.memory_space<vmem>>, vector<8x1xf32>
    %15 = vector.broadcast %14 : vector<8x1xf32> to vector<8x512xf32>
    %16 = arith.addf %13, %15 : vector<8x512xf32>
    %cst_12 = arith.constant 0.000000e+00 : f32
    %17 = vector.broadcast %cst_12 : f32 to vector<8x512xf32>
    %18 = arith.cmpf ogt, %16, %17 : vector<8x512xf32>
    %cst_13 = arith.constant 0.00999999977 : f32
    %19 = vector.broadcast %cst_13 : f32 to vector<8x512xf32>
    %20 = arith.mulf %19, %16 : vector<8x512xf32>
    %21 = arith.select %18, %16, %20 : vector<8x512xi1>, vector<8x512xf32>
    %22 = arith.truncf %21 : vector<8x512xf32> to vector<8x512xbf16>
    %c0_14 = arith.constant 0 : index
    %c0_15 = arith.constant 0 : index
    %23 = vector.load %arg6[%c0_14, %c0_15] : memref<4x8xbf16, #tpu.memory_space<vmem>>, vector<4x8xbf16>
    %cst_16 = arith.constant dense<0.000000e+00> : vector<4x512xf32>
    %24 = tpu.matmul %23, %22, %cst_16 {dimension_numbers = #tpu.dot_dimension_numbers<[1], [0], [0], [1], [0, 0, 1, 1], [], []>} : vector<4x8xbf16>, vector<8x512xbf16>, vector<4x512xf32> -> vector<4x512xf32>
    %c0_17 = arith.constant 0 : index
    %c0_18 = arith.constant 0 : index
    %25 = vector.load %arg7[%c0_17, %c0_18] : memref<4x1xf32, #tpu.memory_space<vmem>>, vector<4x1xf32>
    %26 = vector.broadcast %25 : vector<4x1xf32> to vector<4x512xf32>
    %27 = arith.addf %24, %26 : vector<4x512xf32>
    %cst_19 = arith.constant 0.000000e+00 : f32
    %28 = vector.broadcast %cst_19 : f32 to vector<4x512xf32>
    %29 = arith.cmpf ogt, %27, %28 : vector<4x512xf32>
    %cst_20 = arith.constant 0.00999999977 : f32
    %30 = vector.broadcast %cst_20 : f32 to vector<4x512xf32>
    %31 = arith.mulf %30, %27 : vector<4x512xf32>
    %32 = arith.select %29, %27, %31 : vector<4x512xi1>, vector<4x512xf32>
    %33 = arith.truncf %32 : vector<4x512xf32> to vector<4x512xbf16>
    %c0_21 = arith.constant 0 : index
    %c0_22 = arith.constant 0 : index
    %34 = vector.load %arg8[%c0_21, %c0_22] : memref<1x4xbf16, #tpu.memory_space<vmem>>, vector<1x4xbf16>
    %cst_23 = arith.constant dense<0.000000e+00> : vector<1x512xf32>
    %35 = tpu.matmul %34, %33, %cst_23 {dimension_numbers = #tpu.dot_dimension_numbers<[1], [0], [0], [1], [0, 0, 1, 1], [], []>} : vector<1x4xbf16>, vector<4x512xbf16>, vector<1x512xf32> -> vector<1x512xf32>
    %c0_24 = arith.constant 0 : index
    %c0_25 = arith.constant 0 : index
    %36 = vector.load %arg9[%c0_24, %c0_25] : memref<1x1xf32, #tpu.memory_space<vmem>>, vector<1x1xf32>
    %37 = vector.broadcast %36 : vector<1x1xf32> to vector<1x512xf32>
    %38 = arith.addf %35, %37 : vector<1x512xf32>
    %c0_26 = arith.constant 0 : index
    %c0_27 = arith.constant 0 : index
    %39 = vector.load %arg10[%c0_26, %c0_27] : memref<1x512xf32, #tpu.memory_space<vmem>>, vector<1x512xf32>
    tpu.vector_store %arg10[%c0_26, %c0_27], %38 {strides = array<i32>} : memref<1x512xf32, #tpu.memory_space<vmem>>, vector<1x512xf32>,
    return
  }
  func.func @transform_0(%arg0: i32) -> (i32, i32) {
    %c0_i32 = arith.constant 0 : i32
    %c0_i32_0 = arith.constant 0 : i32
    return %c0_i32, %arg0 : i32, i32
  }
  func.func @transform_1(%arg0: i32) -> (i32, i32) {
    %c0_i32 = arith.constant 0 : i32
    %c0_i32_0 = arith.constant 0 : i32
    %c0_i32_1 = arith.constant 0 : i32
    return %c0_i32, %c0_i32_0 : i32, i32
  }
  func.func @transform_2(%arg0: i32) -> (i32, i32) {
    %c0_i32 = arith.constant 0 : i32
    %c0_i32_0 = arith.constant 0 : i32
    %c0_i32_1 = arith.constant 0 : i32
    return %c0_i32, %c0_i32_0 : i32, i32
  }
  func.func @transform_3(%arg0: i32) -> (i32, i32) {
    %c0_i32 = arith.constant 0 : i32
    %c0_i32_0 = arith.constant 0 : i32
    %c0_i32_1 = arith.constant 0 : i32
    return %c0_i32, %c0_i32_0 : i32, i32
  }
  func.func @transform_4(%arg0: i32) -> (i32, i32) {
    %c0_i32 = arith.constant 0 : i32
    %c0_i32_0 = arith.constant 0 : i32
    %c0_i32_1 = arith.constant 0 : i32
    return %c0_i32, %c0_i32_0 : i32, i32
  }
  func.func @transform_5(%arg0: i32) -> (i32, i32) {
    %c0_i32 = arith.constant 0 : i32
    %c0_i32_0 = arith.constant 0 : i32
    %c0_i32_1 = arith.constant 0 : i32
    return %c0_i32, %c0_i32_0 : i32, i32
  }
  func.func @transform_6(%arg0: i32) -> (i32, i32) {
    %c0_i32 = arith.constant 0 : i32
    %c0_i32_0 = arith.constant 0 : i32
    %c0_i32_1 = arith.constant 0 : i32
    return %c0_i32, %c0_i32_0 : i32, i32
  }
  func.func @transform_7(%arg0: i32) -> (i32, i32) {
    %c0_i32 = arith.constant 0 : i32
    %c0_i32_0 = arith.constant 0 : i32
    %c0_i32_1 = arith.constant 0 : i32
    return %c0_i32, %c0_i32_0 : i32, i32
  }
  func.func @transform_8(%arg0: i32) -> (i32, i32) {
    %c0_i32 = arith.constant 0 : i32
    %c0_i32_0 = arith.constant 0 : i32
    %c0_i32_1 = arith.constant 0 : i32
    return %c0_i32, %c0_i32_0 : i32, i32
  }
  func.func @transform_9(%arg0: i32) -> (i32, i32) {
    %c0_i32 = arith.constant 0 : i32
    %c0_i32_0 = arith.constant 0 : i32
    return %c0_i32, %arg0 : i32, i32
  }
}

</mosaic_0001>

<bundles_post_ra>
// kernel: tpu_custom_call.1
= control target key start
LH: loop header
LB: loop body
LE: loop exit
PB: predicated region body
PF: predicated region fallthrough
CT: control target
= control target key end

     0   :  { %s1313_s0 = inlined_call_operand.hbm [shape: bf16[32,2048], index: 0, kind: input, shape index: {}]   ;;  %s1314_s1 = inlined_call_operand.vmem [shape: bf16[4,32], index: 1, kind: input, shape index: {}]   ;;  %s1315_s2 = inlined_call_operand.vmem [shape: f32[4,1], index: 2, kind: input, shape index: {}]   ;;  %s1316_s3 = inlined_call_operand.vmem [shape: bf16[8,4], index: 3, kind: input, shape index: {}]   ;;  %s1317_s4 = inlined_call_operand.vmem [shape: f32[8,1], index: 4, kind: input, shape index: {}]   ;;  %s1318_s5 = inlined_call_operand.vmem [shape: bf16[4,8], index: 5, kind: input, shape index: {}]   ;;  %s1319_s6 = inlined_call_operand.vmem [shape: f32[4,1], index: 6, kind: input, shape index: {}]   ;;  %s1320_s7 = inlined_call_operand.vmem [shape: bf16[1,4], index: 7, kind: input, shape index: {}]   ;;  %s1321_s8 = inlined_call_operand.<no memory space> [shape: f32[1,1], index: 8, kind: input, shape index: {}]   ;;  %s1322_s9 = inlined_call_operand.hbm [shape: f32[1,2048], index: 9, kind: output, shape index: {}]  }
   0x1   :  { %v14_v0 = vstv %s1321_s8 }
   0x2   :  { %15 = vst [vmem:[#allocation2] sm:$0x1] %v14_v0 }
   0x3   :  { %16 = vsyncpa [#allocation4], 0 }
   0x4   :  { %18 = vsyncpa [#allocation4 + $0x1], 0 }
   0x5   :  { %19 = vsyncpa [#allocation5], 0 }
   0x6   :  { %21 = vsyncpa [#allocation5 + $0x1], 0  ;;  %s1125_s11 = smov 0   ;;  %s1127_s12 = smov 0  }
   0x7   :  { %s1129_s13 = smov 0   ;;  %s1131_s14 = smov 0  }
   0x8 LB: > { %1324 = sst [smem:[#allocation9_spill]] %s1062_s13  ;;  %s1146_s8 = sadd.s32 4294967295, %s1066_s14   ;;  %s1066_s14 = sphi %s1131_s14, %s1335_s14   ;;  %s1062_s13 = sphi %s1129_s13, %s1332_s13   ;;  %s1058_s12 = sphi %s1127_s12, %s1334_s12   ;;  %s1054_s11 = sphi %s1125_s11, %s1333_s11  }
   0x9   : > { %s848_s15 = sadd.s32 4294967294, %s1066_s14   ;;  %s1150_s16 = sadd.s32 1, %s1066_s14  }
   0xa   : > { %s34_s17 = sadd.s32 1, %s1062_s13  ;;  %s31_s18 = ssub.s32 %s1066_s14, %s1150_s16 }
   0xb   : > { %p41_p0 = scmp.ne.s32.totalorder %s1062_s13, %s1058_s12  ;;  %p32_p1 = scmp.eq.s32.totalorder %s31_s18, 0 }
   0xc   : > { %p42_p2 = scmp.eq.s32.totalorder %s1066_s14, 0  ;;  %p47_p3 = scmp.ne.s32.totalorder %s1058_s12, %s1054_s11 }
   0xd   : > { %p48_p4 = scmp.eq.s32.totalorder %s1146_s8, 0  ;;  %p239_p7 = scmp.eq.s32.totalorder %s1146_s8, 3 }
   0xe   : > { %s1162_s19 = scalar_select %p32_p1, %s1062_s13, %s34_s17  }
   0xf   : > { %p1164_p5 = por %p42_p2, %p41_p0  ;;  %p1168_p6 = por %p48_p4, %p47_p3 }
  0x10   : > { %1325 = sst [smem:[#allocation10_spill]] %s1162_s19  ;;  %p245_p8 = scmp.eq.s32.totalorder %s848_s15, 3 }
  0x11   : > { %p930_p9 = scmp.lt.s32.totalorder %s1066_s14, 4  ;;  %p1174_p10 = por %p239_p7, %p41_p0 }
  0x12   : > { %p1178_p11 = por %p245_p8, %p47_p3  ;;  %s289_s24 = sand.u32 1, %s1062_s13  }
  0x13   : > { %s909_s25 = sshll.u32 %s1066_s14, 4  ;;  %s851_s26 = sshll.u32 %s289_s24, 6 }
  0x14   : > { %s298_s29 = scalar_lea.hbm %s1313_s0, %s909_s25  ;;  %s293_s10 = scalar_lea.vmem [#allocation3], %s851_s26 }
  0x15   : > { %s299_s30 = sshll.u32 %s298_s29, 4  ;;  %s301_s17 = sshll.u32 %s293_s10, 4  ;;  %s300_s30 = int_to_ptr.hbm [resolvable:$true] %s299_s30  ;;  %s302_s17 = int_to_ptr.vmem [resolvable:$true] %s301_s17 }
  0x16   : > { %p1189_p12 = pnand %p930_p9, %p1164_p5  ;;  %p854_p13 = scmp.ge.s32.totalorder %s1066_s14, 1 }
  0x17   : > { %s290_s18 = scalar_lea.sflag [#allocation4], %s289_s24  ;;  %s970_s19 = sshra.s32 %s300_s30, 4  ;;  %s971_s19 = int_to_ptr.hbm [resolvable:$true] %s970_s19 }
  0x18   : > { %s972_s13 = scalar_lea.hbm %s971_s19, 64  ;;  %p974_p1 = pneg %p1189_p12 }
  0x19   : > { %p973_p0 = scmp.ne.s32.totalorder %s971_s19, %s972_s13  ;;  %s977_s27 = scalar_lea.hbm %s1313_s0, 256 }
  0x1a   : > { %p978_p4 = scmp.lt.s32.totalorder %s971_s19, %s1313_s0  ;;  %p979_p5 = scmp.lt.s32.totalorder %s977_s27, %s972_s13 }
  0x1b   : > { %p975_p2 = pnand %p974_p1, %p973_p0 }
  0x1c   : > { %p980_p7 = por %p979_p5, %p978_p4 }
  0x1d   : > { %p976_p3 = pneg %p975_p2 }
  0x1f   : > { %p981_p8 = pnand %p980_p7, %p976_p3 }
  0x21   : > { %984 = shalt.err (!%p981_p8)
}
  0x22   : > { %s1068_s24 = smov 1024   ;;  %s1069_s29 = smov 256  }
  0x23   : > { %s1070_s10 = smov 16   ;;  %p309_p9 = scmp.lt.s32.totalorder %s1066_s14, 5 }
  0x24   : > { %925 = dma.hbm_to_vmem [thread:$0]  (!%p1189_p12), %s300_s30, 1024, %s302_s17, %s290_s18, %s1068_s24, %s1069_s29, %s1070_s10  }
  0x25   : > { %p310_p0 = pnand %p854_p13, %p309_p9 }
  0x26   : > { %s1208_s25 = sand.u32 (!%p310_p0), 1, %s1058_s12  }
  0x27   : > { %313 = sbr.rel (%p310_p0) target bundleno = 628 (0x274), region = 56  ;;  %s855_s13 = sshll.u32 (!%p310_p0), %s1208_s25, 6 }
  0x28   : > { %s316_s19 = scalar_lea.sflag (!%p310_p0), [#allocation4], %s1208_s25  ;;  %s1212_s26 = scalar_lea.vmem (!%p310_p0), [#allocation3], %s855_s13 }
  0x2c   : > { %1045 = dma.done.wait (%p1168_p6), %s316_s19, 1024  }
  0x2d   : > { %1047 = vsyncadd (%p1168_p6), %s316_s19, 4294966272  ;;  %v1071_v1 = vmov 0   ;;  %v875_v2 = vld [vmem:[%s1212_s26 + $0x20] sm:$0xf]  ;;  %v916_v3 = vld [vmem:[%s1212_s26 + $0x2c] sm:$0xf0] }
  0x2e   : > { %968 = vset.pattern.permute.xlu0 %v1071_v1  ;;  %969 = vset.pattern.permute.xlu1 %v1071_v1  ;;  %v914_v4 = vld [vmem:[%s1212_s26 + $0x24] sm:$0xf]  ;;  %v876_v5 = vor.u32 %v916_v3, %v875_v2  ;;  %v877_v6 = vld [vmem:[%s1212_s26 + $0x30] sm:$0xf0]  ;;  %v883_v7 = vld [vmem:[%s1212_s26 + $0x28] sm:$0xf] }
  0x2f   : > { %v917_v8 = vld [vmem:[%s1212_s26 + $0x34] sm:$0xf0]  ;;  %v880_v9 = vor.u32 %v914_v4, %v877_v6  ;;  %v915_v11 = vld [vmem:[%s1212_s26 + $0x2c] sm:$0xf]  ;;  %v885_v12 = vld [vmem:[%s1212_s26 + $0x38] sm:$0xf0] }
  0x30   : > { %v884_v10 = vor.u32 %v917_v8, %v883_v7  ;;  %v859_v13 = vld [vmem:[%s1212_s26] sm:$0xf]  ;;  %423 = vmatpush.bf16.msra.mxu0 %v876_v5  ;;  %v888_v14 = vor.u32 %v915_v11, %v885_v12  ;;  %v912_v15 = vld [vmem:[%s1212_s26 + $0xc] sm:$0xf0]  ;;  %v910_v16 = vld [vmem:[%s1212_s26 + $0x4] sm:$0xf] }
  0x31   : > { %v861_v17 = vld [vmem:[%s1212_s26 + $0x10] sm:$0xf0]  ;;  %436 = vmatpush.bf16.msra.mxu1 %v880_v9  ;;  %v860_v18 = vor.u32 %v912_v15, %v859_v13  ;;  %v867_v20 = vld [vmem:[%s1212_s26 + $0x8] sm:$0xf]  ;;  %v913_v21 = vld [vmem:[%s1212_s26 + $0x14] sm:$0xf0] }
  0x32   : > { %449 = vmatpush.bf16.msra.mxu2 %v884_v10  ;;  %v864_v19 = vor.u32 %v910_v16, %v861_v17  ;;  %v911_v22 = vld [vmem:[%s1212_s26 + $0xc] sm:$0xf]  ;;  %462 = vmatpush.bf16.msra.mxu3 %v888_v14  ;;  %v868_v23 = vor.u32 %v913_v21, %v867_v20  ;;  %v869_v24 = vld [vmem:[%s1212_s26 + $0x18] sm:$0xf0]  ;;  %vm413_vm0 = vcmask 261120   ;;  %vm496_vm3 = vcmask 1041408  }
  0x33   : > { %v367_v25 = vld [vmem:[%s1315_s2] sm:$0xf]  ;;  %v872_v26 = vor.u32 %v911_v22, %v869_v24  ;;  %vm492_vm4 = vcmask 31744   ;;  %vm588_vm9 = vcmask 1043456   ;;  %vm584_vm10 = vcmask 64512   ;;  %s856_s21 = sshll.u32 %s1208_s25, 2 }
  0x34   : > { %370 = vperm.xlu0 %968, %v367_v25   ;;  %424 = vmatpush.bf16.msra.mxu0 %v860_v18  ;;  %v366_v27 = vld [vmem:[%s1314_s1] sm:$0x3]  ;;  %s906_s30 = sshll.u32 %s1146_s8, 2  ;;  %s354_s27 = scalar_lea.vmem [#allocation6], %s856_s21 }
  0x35   : > { %437 = vmatpush.bf16.msra.mxu1 %v864_v19  ;;  %v486_v28 = vld [vmem:[%s1317_s4] sm:$0xff]  ;;  %s773_s18 = scalar_lea.hbm %s1322_s9, %s906_s30  ;;  %s775_s20 = sshll.u32 %s354_s27, 4  ;;  %s776_s20 = int_to_ptr.vmem [resolvable:$true] %s775_s20 }
  0x36   : > { %450 = vmatpush.bf16.msra.mxu2 %v868_v23  ;;  %463 = vmatpush.bf16.msra.mxu3 %v872_v26  ;;  %v485_v47 = vld [vmem:[%s1316_s3] sm:$0xf]  ;;  %s777_s28 = sshll.u32 %s773_s18, 4  ;;  %s763_s8 = scalar_lea.sflag [#allocation5], %s1208_s25  ;;  %s778_s28 = int_to_ptr.hbm [resolvable:$true] %s777_s28 }
  0x37   : > { %889 = vmatmul.msk.bf16.vlgmr.msra.gmra.mxu0 %vm413_vm0, %v366_v27  ;;  %v578_v59 = vld [vmem:[%s1319_s6] sm:$0xf]  ;;  %s1014_s24 = sshra.s32 %s778_s28, 4  ;;  %s1020_s19 = scalar_lea.hbm %s1322_s9, 16  ;;  %s1015_s24 = int_to_ptr.hbm [resolvable:$true] %s1014_s24 }
  0x38   : > { %890 = vmatmul.msk.bf16.vlgmr.msra.gmra.mxu1 %vm413_vm0, %v366_v27  ;;  %581 = vperm.xlu1 %969, %v578_v59   ;;  %v670_v60 = vld [vmem:[#allocation2] sm:$0x1]  ;;  %s1016_s29 = scalar_lea.hbm %s1015_s24, 4  ;;  %p1021_p1 = scmp.lt.s32.totalorder %s1015_s24, %s1322_s9 }
  0x39   : > { %891 = vmatmul.msk.bf16.vlgmr.msra.gmra.mxu2 %vm413_vm0, %v366_v27  ;;  %892 = vmatmul.msk.bf16.vlgmr.msra.gmra.mxu3 %vm413_vm0, %v366_v27  ;;  %v577_v11 = vld [vmem:[%s1318_s5] sm:$0x3]  ;;  %p1017_p6 = scmp.ne.s32.totalorder %s1015_s24, %s1016_s29  ;;  %p1022_p2 = scmp.lt.s32.totalorder %s1020_s19, %s1016_s29 }
  0x3b   : > { %p1018_p12 = pnand %p1017_p6, %p1174_p10  ;;  %p1023_p3 = por %p1022_p2, %p1021_p1 }
  0x3c   : > { %489 = vperm.xlu0 %968, %v486_v28  }
  0x3d   : > { %p1019_p13 = pneg %p1018_p12 }
  0x3f   : > { %p1024_p4 = pnand %p1023_p3, %p1019_p13 }
  0x40   : > { %673 = vperm.xlu1 %969, %v670_v60  }
  0xa6   : > { %v371_v29 = vpop.permute.xlu0 %370 }
  0xaa   : > { %v582_v27 = vpop.permute.xlu1 %581 }
  0xae   : > { %v490_v61 = vpop.permute.xlu0 %489 }
  0xb4   : > { %v426_v30 = vpop.f32.mrf.mxu0 }
  0xb5   : > { %v427_v31 = vadd.f32 %v426_v30, %v371_v29  ;;  %v439_v32 = vpop.f32.mrf.mxu1 }
  0xb6   : > { %v440_v33 = vadd.f32 %v439_v32, %v371_v29 }
  0xb7   : > { %v473_v34 = vmul.f32 0.01, %v427_v31  ;;  %vm469_vm1 = vcmp.gt.f32.partialorder %v427_v31, 0.0 }
  0xb8   : > { %v474_v35 = vmul.f32 0.01, %v440_v33  ;;  %vm470_vm2 = vcmp.gt.f32.partialorder %v440_v33, 0.0 }
  0xb9   : > { %v477_v36 = vsel %vm469_vm1, %v427_v31, %v473_v34  ;;  %vm751_vm1 = vcmask 1040384  }
  0xba   : > { %v481_v37 = vpack.c.bf16 %v477_v36, %v477_v36  ;;  %v478_v38 = vsel %vm470_vm2, %v440_v33, %v474_v35  ;;  %vm753_vm2 = vcmask 1042434  }
  0xbb   : > { %v482_v40 = vpack.c.bf16 %v478_v38, %v478_v38 }
  0xbc   : > { %v452_v39 = vpop.f32.mrf.mxu2  ;;  %v465_v42 = vpop.f32.mrf.mxu3  ;;  %v498_v43 = vsel %vm496_vm3, %v481_v37, 0 }
  0xbd   : > { %v453_v41 = vadd.f32 %v452_v39, %v371_v29  ;;  %v428_v44 = vpop.f32.mrf.mxu0  ;;  %v466_v45 = vadd.f32 %v465_v42, %v371_v29  ;;  %516 = vmatpush.bf16.msrb.mxu0 %v498_v43  ;;  %v501_v46 = vsel %vm496_vm3, %v482_v40, 0  ;;  %v441_v48 = vpop.f32.mrf.mxu1 }
  0xbe   : > { %529 = vmatpush.bf16.msrb.mxu1 %v501_v46 }
  0xbf   : > { %v475_v49 = vmul.f32 0.01, %v453_v41  ;;  %vm471_vm5 = vcmp.gt.f32.partialorder %v453_v41, 0.0  ;;  %v476_v50 = vmul.f32 0.01, %v466_v45  ;;  %vm472_vm6 = vcmp.gt.f32.partialorder %v466_v45, 0.0 }
  0xc0   : > { %893 = vmatmul.msk.bf16.vlgmr.msrb.gmra.mxu0 %vm492_vm4, %v485_v47 }
  0xc1   : > { %v479_v51 = vsel %vm471_vm5, %v453_v41, %v475_v49  ;;  %894 = vmatmul.msk.bf16.vlgmr.msrb.gmra.mxu1 %vm492_vm4, %v485_v47  ;;  %v480_v53 = vsel %vm472_vm6, %v466_v45, %v476_v50  ;;  %v669_v41 = vld [vmem:[%s1320_s7] sm:$0x1] }
  0xc2   : > { %v483_v52 = vpack.c.bf16 %v479_v51, %v479_v51  ;;  %v484_v54 = vpack.c.bf16 %v480_v53, %v480_v53 }
  0xc4   : > { %v454_v55 = vpop.f32.mrf.mxu2  ;;  %v504_v56 = vsel %vm496_vm3, %v483_v52, 0  ;;  %v467_v57 = vpop.f32.mrf.mxu3  ;;  %v507_v58 = vsel %vm496_vm3, %v484_v54, 0 }
  0xc5   : > { %542 = vmatpush.bf16.msrb.mxu2 %v504_v56  ;;  %555 = vmatpush.bf16.msrb.mxu3 %v507_v58 }
  0xc8   : > { %895 = vmatmul.msk.bf16.vlgmr.msrb.gmra.mxu2 %vm492_vm4, %v485_v47  ;;  %896 = vmatmul.msk.bf16.vlgmr.msrb.gmra.mxu3 %vm492_vm4, %v485_v47 }
 0x13d   : > { %v518_v62 = vpop.f32.mrf.mxu0 }
 0x13e   : > { %v519_v63 = vadd.f32 %v518_v62, %v490_v61  ;;  %v531_v0 = vpop.f32.mrf.mxu1 }
 0x13f   : > { %v532_v1 = vadd.f32 %v531_v0, %v490_v61 }
 0x140   : > { %vm561_vm7 = vcmp.gt.f32.partialorder %v519_v63, 0.0  ;;  %v565_v2 = vmul.f32 0.01, %v519_v63 }
 0x141   : > { %vm562_vm8 = vcmp.gt.f32.partialorder %v532_v1, 0.0  ;;  %v566_v3 = vmul.f32 0.01, %v532_v1 }
 0x142   : > { %v569_v4 = vsel %vm561_vm7, %v519_v63, %v565_v2 }
 0x143   : > { %v573_v5 = vpack.c.bf16 %v569_v4, %v569_v4  ;;  %v570_v6 = vsel %vm562_vm8, %v532_v1, %v566_v3  ;;  %v757_v3 = vlaneseq }
 0x144   : > { %v574_v7 = vpack.c.bf16 %v570_v6, %v570_v6 }
 0x145   : > { %v590_v8 = vsel %vm588_vm9, %v573_v5, 0  ;;  %v520_v9 = vpop.f32.mrf.mxu0 }
 0x146   : > { %608 = vmatpush.bf16.msra.mxu0 %v590_v8  ;;  %v593_v10 = vsel %vm588_vm9, %v574_v7, 0  ;;  %v533_v12 = vpop.f32.mrf.mxu1 }
 0x147   : > { %621 = vmatpush.bf16.msra.mxu1 %v593_v10 }
 0x149   : > { %897 = vmatmul.msk.bf16.vlgmr.msra.gmra.mxu0 %vm584_vm10, %v577_v11 }
 0x14a   : > { %898 = vmatmul.msk.bf16.vlgmr.msra.gmra.mxu1 %vm584_vm10, %v577_v11 }
 0x14b   : > { %v544_v13 = vpop.f32.mrf.mxu2  ;;  %v557_v15 = vpop.f32.mrf.mxu3 }
 0x14c   : > { %v545_v14 = vadd.f32 %v544_v13, %v490_v61  ;;  %v558_v16 = vadd.f32 %v557_v15, %v490_v61  ;;  %v674_v61 = vpop.permute.xlu1 %673 }
 0x14d   : > { %v676_v62 = vperm.slane %v674_v61, 0 }
 0x14e   : > { %vm563_vm11 = vcmp.gt.f32.partialorder %v545_v14, 0.0  ;;  %v567_v17 = vmul.f32 0.01, %v545_v14  ;;  %vm564_vm12 = vcmp.gt.f32.partialorder %v558_v16, 0.0  ;;  %v568_v18 = vmul.f32 0.01, %v558_v16 }
 0x150   : > { %v571_v19 = vsel %vm563_vm11, %v545_v14, %v567_v17  ;;  %v572_v21 = vsel %vm564_vm12, %v558_v16, %v568_v18 }
 0x151   : > { %v575_v20 = vpack.c.bf16 %v571_v19, %v571_v19  ;;  %v576_v22 = vpack.c.bf16 %v572_v21, %v572_v21 }
 0x153   : > { %v546_v23 = vpop.f32.mrf.mxu2  ;;  %v596_v24 = vsel %vm588_vm9, %v575_v20, 0  ;;  %v559_v25 = vpop.f32.mrf.mxu3  ;;  %v599_v26 = vsel %vm588_vm9, %v576_v22, 0 }
 0x154   : > { %634 = vmatpush.bf16.msra.mxu2 %v596_v24  ;;  %647 = vmatpush.bf16.msra.mxu3 %v599_v26 }
 0x157   : > { %899 = vmatmul.msk.bf16.vlgmr.msra.gmra.mxu2 %vm584_vm10, %v577_v11  ;;  %900 = vmatmul.msk.bf16.vlgmr.msra.gmra.mxu3 %vm584_vm10, %v577_v11 }
 0x1c6   : > { %v610_v28 = vpop.f32.mrf.mxu0 }
 0x1c7   : > { %v611_v29 = vadd.f32 %v610_v28, %v582_v27  ;;  %v623_v30 = vpop.f32.mrf.mxu1 }
 0x1c8   : > { %v624_v31 = vadd.f32 %v623_v30, %v582_v27 }
 0x1c9   : > { %vm653_vm13 = vcmp.gt.f32.partialorder %v611_v29, 0.0  ;;  %v657_v32 = vmul.f32 0.01, %v611_v29 }
 0x1ca   : > { %vm654_vm14 = vcmp.gt.f32.partialorder %v624_v31, 0.0  ;;  %v658_v33 = vmul.f32 0.01, %v624_v31 }
 0x1cb   : > { %v661_v34 = vsel %vm653_vm13, %v611_v29, %v657_v32 }
 0x1cc   : > { %v665_v35 = vpack.c.bf16 %v661_v34, %v661_v34  ;;  %v662_v36 = vsel %vm654_vm14, %v624_v31, %v658_v33 }
 0x1cd   : > { %v666_v37 = vpack.c.bf16 %v662_v36, %v662_v36 }
 0x1ce   : > { %v681_v38 = vsel %vm496_vm3, %v665_v35, 0  ;;  %v612_v39 = vpop.f32.mrf.mxu0 }
 0x1cf   : > { %699 = vmatpush.bf16.msrb.mxu0 %v681_v38  ;;  %v684_v40 = vsel %vm496_vm3, %v666_v37, 0  ;;  %v625_v42 = vpop.f32.mrf.mxu1 }
 0x1d0   : > { %712 = vmatpush.bf16.msrb.mxu1 %v684_v40 }
 0x1d2   : > { %901 = vmatmul.msk.bf16.vlgmr.msrb.gmra.mxu0 %vm492_vm4, %v669_v41 }
 0x1d3   : > { %902 = vmatmul.msk.bf16.vlgmr.msrb.gmra.mxu1 %vm492_vm4, %v669_v41 }
 0x1da   : > { %v636_v43 = vpop.f32.mrf.mxu2  ;;  %v649_v45 = vpop.f32.mrf.mxu3 }
 0x1db   : > { %v637_v44 = vadd.f32 %v636_v43, %v582_v27  ;;  %v650_v46 = vadd.f32 %v649_v45, %v582_v27 }
 0x1dd   : > { %vm655_vm15 = vcmp.gt.f32.partialorder %v637_v44, 0.0  ;;  %v659_v47 = vmul.f32 0.01, %v637_v44  ;;  %vm656_vm0 = vcmp.gt.f32.partialorder %v650_v46, 0.0  ;;  %v660_v48 = vmul.f32 0.01, %v650_v46 }
 0x1df   : > { %v663_v49 = vsel %vm655_vm15, %v637_v44, %v659_v47  ;;  %v664_v51 = vsel %vm656_vm0, %v650_v46, %v660_v48 }
 0x1e0   : > { %v667_v50 = vpack.c.bf16 %v663_v49, %v663_v49  ;;  %v668_v52 = vpack.c.bf16 %v664_v51, %v664_v51 }
 0x1e2   : > { %v638_v53 = vpop.f32.mrf.mxu2  ;;  %v687_v54 = vsel %vm496_vm3, %v667_v50, 0  ;;  %v651_v55 = vpop.f32.mrf.mxu3  ;;  %v690_v56 = vsel %vm496_vm3, %v668_v52, 0 }
 0x1e3   : > { %725 = vmatpush.bf16.msrb.mxu2 %v687_v54  ;;  %738 = vmatpush.bf16.msrb.mxu3 %v690_v56 }
 0x1e6   : > { %903 = vmatmul.msk.bf16.vlgmr.msrb.gmra.mxu2 %vm492_vm4, %v669_v41  ;;  %904 = vmatmul.msk.bf16.vlgmr.msrb.gmra.mxu3 %vm492_vm4, %v669_v41  ;;  %vm759_vm4 = vcmp.lt.s32.totalorder %v757_v3, 512 }
 0x24f   : > { %v701_v57 = vpop.f32.mrf.mxu0 }
 0x250   : > { %v714_v58 = vpop.f32.mrf.mxu1  ;;  %v702_v7 = vadd.f32 %v701_v57, %v676_v62 }
 0x251   : > { %v715_v63 = vadd.f32 %v714_v58, %v676_v62 }
 0x253   : > { %v748_v4 = vrot.slane %v715_v63, 7 }
 0x255   : > { %v752_v9 = vsel %vm751_vm1, %v702_v7, %v748_v4 }
 0x257   : > { %v703_v59 = vpop.f32.mrf.mxu0 }
 0x258   : > { %v716_v60 = vpop.f32.mrf.mxu1 }
 0x269   : > { %v727_v0 = vpop.f32.mrf.mxu2  ;;  %v740_v2 = vpop.f32.mrf.mxu3 }
 0x26a   : > { %v728_v1 = vadd.f32 %v727_v0, %v676_v62  ;;  %v741_v5 = vadd.f32 %v740_v2, %v676_v62 }
 0x26c   : > { %v749_v6 = vrot.slane %v728_v1, 6  ;;  %v750_v8 = vrot.slane %v741_v5, 5 }
 0x26e   : > { %v754_v10 = vsel %vm753_vm2, %v749_v6, %v750_v8 }
 0x26f   : > { %v755_v11 = vsel %vm496_vm3, %v752_v9, %v754_v10 }
 0x270   : > { %761 = vst.msk [vmem:[%s354_s27] sm:$0xf] %vm759_vm4, %v755_v11 }
 0x271   : > { %v729_v12 = vpop.f32.mrf.mxu2  ;;  %v742_v13 = vpop.f32.mrf.mxu3 }
 0x272   : > { %1027 = shalt.err (!%p1024_p4)
}
 0x273   : > { %920 = dma.vmem_to_hbm [thread:$0]  (%p1174_p10), %s776_s20, 64, %s778_s28, %s763_s8  }
 0x274 PF: > { %p931_p5 = scmp.ge.s32.totalorder %s1066_s14, 2  ;;  %s789_s25 = sand.u32 1, %s1054_s11  }
 0x275   : > { %s790_s30 = scalar_lea.sflag [#allocation5], %s789_s25 }
 0x276   : > { %p927_p7 = pnand %p931_p5, %p1178_p11 }
 0x278   : > { %p928_p8 = pneg %p927_p7 }
 0x27a   : > { %1049 = dma.done.wait (%p928_p8), %s790_s30, 64  }
 0x27b   : > { %1051 = vsyncadd (%p928_p8), %s790_s30, 4294967232  ;;  %s1331_s17 = sld [smem:[#allocation9_spill]]  ;;  %p24_p9 = scmp.ge.s32.totalorder %s1150_s16, 6  }
 0x27c   : > { %s1332_s13 = sld [smem:[#allocation10_spill]]  ;;  %s1333_s11 = smov %s1058_s12 }
 0x27d   : > { %s1335_s14 = smov %s1150_s16  ;;  %26 = sbr.rel (!%p24_p9) target bundleno = 8 (0x8), region = 101 }
 0x281   : > { %s1334_s12 = smov %s1331_s17 }
 0x282   :  { %796 = vsyncpa [#allocation4], 1 }
 0x283   :  { %798 = vsyncpa [#allocation4 + $0x1], 1 }
 0x284   :  { %799 = vsyncpa [#allocation5], 1 }
 0x285   :  { %801 = vsyncpa [#allocation5 + $0x1], 1 }

</bundles_post_ra>
